<compile_context>
chip_gen: v7x
topology: tpu7x:2x2x1
jax: 0.10.0
libtpu: 0.0.40
codegen_flags: <defaults>
</compile_context>

<pallas_src>
import jax
import jax.numpy as jnp
from jax.experimental import pallas as pl
from jax.experimental.pallas import tpu as pltpu


def _mlp_kernel(x_ref, w1_ref, b1_ref, w2_ref, b2_ref, o_ref):
    # layer 1: y = x @ W1t + b1, then ReLU   (W1t already (in_p, hid_p), no transpose)
    h = jnp.dot(x_ref[...], w1_ref[...],
                preferred_element_type=jnp.float32) + b1_ref[...]
    h = jnp.maximum(h, 0.0)

    # layer 2 (output head, no activation): logits = h @ W2t + b2
    logits = jnp.dot(h.astype(w2_ref.dtype), w2_ref[...],
                     preferred_element_type=jnp.float32) + b2_ref[...]
    o_ref[...] = logits.astype(o_ref.dtype)


def _round_up(n, m):
    return (n + m - 1) // m * m


def relu_mlp_forward(x, w1, b1, w2, b2, *, block_b=128, compute_dtype=None):
    """Fused RELuMLP forward via a single batch-tiled Pallas kernel.

    x:  (batch, num_inputs)
    w1: (hidden, num_inputs)   b1: (hidden,)      (PyTorch nn.Linear layout)
    w2: (num_actions, hidden)  b2: (num_actions,)
    returns (batch, num_actions) logits.
    """
    batch, num_inputs = x.shape
    hidden = w1.shape[0]
    num_actions = w2.shape[0]

    LANE = 128
    in_p = _round_up(num_inputs, LANE)
    hid_p = _round_up(hidden, LANE)
    out_p = _round_up(num_actions, LANE)

    # Batch tiling: TB=block_b rows per grid step (multiple of 8 sublanes).
    # block_b=128 keeps per-step VMEM well under v7x's 64 MiB even with double
    # buffering; raise for very large batches if profiling shows DMA exposure.
    if batch <= block_b:
        tb = _round_up(max(batch, 1), 8)
        b_p = tb
    else:
        tb = block_b
        b_p = _round_up(batch, tb)
    grid = (b_p // tb,)

    out_dtype = x.dtype
    cdt = x.dtype if compute_dtype is None else compute_dtype

    # Zero-pad + pre-transpose (zero padding is exact for linear + ReLU: padded
    # input lanes contribute 0, padded hidden lanes get 0 bias -> 0 after ReLU,
    # and padded rows of W2t are 0 so they never contaminate the real logits).
    x_p = jnp.pad(x, ((0, b_p - batch), (0, in_p - num_inputs))).astype(cdt)
    w1t = jnp.pad(w1.T, ((0, in_p - num_inputs), (0, hid_p - hidden))).astype(cdt)
    b1r = jnp.pad(b1.reshape(1, -1), ((0, 0), (0, hid_p - hidden))).astype(jnp.float32)
    w2t = jnp.pad(w2.T, ((0, hid_p - hidden), (0, out_p - num_actions))).astype(cdt)
    b2r = jnp.pad(b2.reshape(1, -1), ((0, 0), (0, out_p - num_actions))).astype(jnp.float32)

    out_padded = pl.pallas_call(
        _mlp_kernel,
        out_shape=jax.ShapeDtypeStruct((b_p, out_p), out_dtype),
        grid=grid,
        in_specs=[
            pl.BlockSpec((tb, in_p), lambda i: (i, 0)),      # x tile (pipelined)
            pl.BlockSpec((in_p, hid_p), lambda i: (0, 0)),   # W1t (resident)
            pl.BlockSpec((1, hid_p), lambda i: (0, 0)),      # b1  (resident)
            pl.BlockSpec((hid_p, out_p), lambda i: (0, 0)),  # W2t (resident)
            pl.BlockSpec((1, out_p), lambda i: (0, 0)),      # b2  (resident)
        ],
        out_specs=pl.BlockSpec((tb, out_p), lambda i: (i, 0)),
        compiler_params=pltpu.CompilerParams(
            dimension_semantics=("parallel",),
        ),
    )(x_p, w1t, b1r, w2t, b2r)

    return out_padded[:batch, :num_actions]


def init_params(key, num_inputs, hidden, num_actions, dtype=jnp.float32):
    """Deterministic init matching nn.Linear's default U(-1/sqrt(fan_in), 1/sqrt(fan_in))."""
    k1, k2, k3, k4 = jax.random.split(key, 4)
    bound1 = 1.0 / jnp.sqrt(num_inputs)
    bound2 = 1.0 / jnp.sqrt(hidden)
    w1 = jax.random.uniform(k1, (hidden, num_inputs), dtype, -bound1, bound1)
    b1 = jax.random.uniform(k2, (hidden,), dtype, -bound1, bound1)
    w2 = jax.random.uniform(k3, (num_actions, hidden), dtype, -bound2, bound2)
    b2 = jax.random.uniform(k4, (num_actions,), dtype, -bound2, bound2)
    return w1, b1, w2, b2


if __name__ == "__main__":
    # CartPole-v1: observation dim = 4, num_actions = 2; hidden = 32.
    # Use a batch of 256 (rollout of env steps) so the 1-D batch grid (TB=128,
    # 2 grid steps, "parallel") is actually exercised; compute is still tiny.
    num_inputs, hidden, num_actions, batch = 4, 32, 2, 256

    key = jax.random.PRNGKey(0)
    kx, kp = jax.random.split(key)
    x = jax.random.normal(kx, (batch, num_inputs), dtype=jnp.float32)
    w1, b1, w2, b2 = init_params(kp, num_inputs, hidden, num_actions)

    logits = relu_mlp_forward(x, w1, b1, w2, b2)
    jax.block_until_ready(logits)

    # pure-JAX reference check (f32 compute path -> tight tolerance is valid)
    ref = jnp.maximum(x @ w1.T + b1, 0.0) @ w2.T + b2
    assert logits.shape == (batch, num_actions)
    assert jnp.allclose(logits, ref, atol=1e-5, rtol=1e-5), "mismatch vs reference"

    print("KERNEL_OK")
</pallas_src>

<mosaic_0001>
module attributes {stable_mosaic.version = 11 : i64} {
  func.func @_mlp_kernel(%arg0: i32, %arg1: memref<128x128xf32, #tpu.memory_space<vmem>>, %arg2: memref<128x128xf32, #tpu.memory_space<vmem>>, %arg3: memref<1x128xf32, #tpu.memory_space<vmem>>, %arg4: memref<128x128xf32, #tpu.memory_space<vmem>>, %arg5: memref<1x128xf32, #tpu.memory_space<vmem>>, %arg6: memref<128x128xf32, #tpu.memory_space<vmem>>) attributes {dimension_semantics = [#tpu.dimension_semantics<parallel>], iteration_bounds = array<i64: 2>, scalar_prefetch = 0 : i64, scratch_operands = 0 : i64, tpu.core_type = #tpu.core_type<tc>, window_params = [{transform_indices = @transform_0, window_bounds = array<i64: 128, 128>}, {pipeline_mode = #tpu.pipeline_mode<synchronous>, transform_indices = @transform_1, window_bounds = array<i64: 128, 128>}, {pipeline_mode = #tpu.pipeline_mode<synchronous>, transform_indices = @transform_2, window_bounds = array<i64: 1, 128>}, {pipeline_mode = #tpu.pipeline_mode<synchronous>, transform_indices = @transform_3, window_bounds = array<i64: 128, 128>}, {pipeline_mode = #tpu.pipeline_mode<synchronous>, transform_indices = @transform_4, window_bounds = array<i64: 1, 128>}, {transform_indices = @transform_5, window_bounds = array<i64: 128, 128>}]} {
    %c0 = arith.constant 0 : index
    %c0_0 = arith.constant 0 : index
    %0 = vector.load %arg1[%c0, %c0_0] : memref<128x128xf32, #tpu.memory_space<vmem>>, vector<128x128xf32>
    %c0_1 = arith.constant 0 : index
    %c0_2 = arith.constant 0 : index
    %1 = vector.load %arg2[%c0_1, %c0_2] : memref<128x128xf32, #tpu.memory_space<vmem>>, vector<128x128xf32>
    %cst = arith.constant dense<0.000000e+00> : vector<128x128xf32>
    %2 = tpu.matmul %0, %1, %cst {dimension_numbers = #tpu.dot_dimension_numbers<[1], [0], [0], [1], [0, 0, 1, 1], [], []>} : vector<128x128xf32>, vector<128x128xf32>, vector<128x128xf32> -> vector<128x128xf32>
    %c0_3 = arith.constant 0 : index
    %c0_4 = arith.constant 0 : index
    %3 = vector.load %arg3[%c0_3, %c0_4] : memref<1x128xf32, #tpu.memory_space<vmem>>, vector<1x128xf32>
    %4 = vector.broadcast %3 : vector<1x128xf32> to vector<128x128xf32>
    %5 = arith.addf %2, %4 : vector<128x128xf32>
    %cst_5 = arith.constant 0.000000e+00 : f32
    %6 = vector.broadcast %cst_5 : f32 to vector<128x128xf32>
    %7 = arith.maximumf %5, %6 : vector<128x128xf32>
    %c0_6 = arith.constant 0 : index
    %c0_7 = arith.constant 0 : index
    %8 = vector.load %arg4[%c0_6, %c0_7] : memref<128x128xf32, #tpu.memory_space<vmem>>, vector<128x128xf32>
    %cst_8 = arith.constant dense<0.000000e+00> : vector<128x128xf32>
    %9 = tpu.matmul %7, %8, %cst_8 {dimension_numbers = #tpu.dot_dimension_numbers<[1], [0], [0], [1], [0, 0, 1, 1], [], []>} : vector<128x128xf32>, vector<128x128xf32>, vector<128x128xf32> -> vector<128x128xf32>
    %c0_9 = arith.constant 0 : index
    %c0_10 = arith.constant 0 : index
    %10 = vector.load %arg5[%c0_9, %c0_10] : memref<1x128xf32, #tpu.memory_space<vmem>>, vector<1x128xf32>
    %11 = vector.broadcast %10 : vector<1x128xf32> to vector<128x128xf32>
    %12 = arith.addf %9, %11 : vector<128x128xf32>
    %c0_11 = arith.constant 0 : index
    %c0_12 = arith.constant 0 : index
    %13 = vector.load %arg6[%c0_11, %c0_12] : memref<128x128xf32, #tpu.memory_space<vmem>>, vector<128x128xf32>
    tpu.vector_store %arg6[%c0_11, %c0_12], %12 {strides = array<i32>} : memref<128x128xf32, #tpu.memory_space<vmem>>, vector<128x128xf32>,
    return
  }
  func.func @transform_0(%arg0: i32) -> (i32, i32) {
    %c0_i32 = arith.constant 0 : i32
    %c0_i32_0 = arith.constant 0 : i32
    return %arg0, %c0_i32 : i32, i32
  }
  func.func @transform_1(%arg0: i32) -> (i32, i32) {
    %c0_i32 = arith.constant 0 : i32
    %c0_i32_0 = arith.constant 0 : i32
    %c0_i32_1 = arith.constant 0 : i32
    return %c0_i32, %c0_i32_0 : i32, i32
  }
  func.func @transform_2(%arg0: i32) -> (i32, i32) {
    %c0_i32 = arith.constant 0 : i32
    %c0_i32_0 = arith.constant 0 : i32
    %c0_i32_1 = arith.constant 0 : i32
    return %c0_i32, %c0_i32_0 : i32, i32
  }
  func.func @transform_3(%arg0: i32) -> (i32, i32) {
    %c0_i32 = arith.constant 0 : i32
    %c0_i32_0 = arith.constant 0 : i32
    %c0_i32_1 = arith.constant 0 : i32
    return %c0_i32, %c0_i32_0 : i32, i32
  }
  func.func @transform_4(%arg0: i32) -> (i32, i32) {
    %c0_i32 = arith.constant 0 : i32
    %c0_i32_0 = arith.constant 0 : i32
    %c0_i32_1 = arith.constant 0 : i32
    return %c0_i32, %c0_i32_0 : i32, i32
  }
  func.func @transform_5(%arg0: i32) -> (i32, i32) {
    %c0_i32 = arith.constant 0 : i32
    %c0_i32_0 = arith.constant 0 : i32
    return %arg0, %c0_i32 : i32, i32
  }
}

</mosaic_0001>

<bundles_post_ra>
// kernel: tpu_custom_call.1
= control target key start
LH: loop header
LB: loop body
LE: loop exit
PB: predicated region body
PF: predicated region fallthrough
CT: control target
= control target key end

     0   :  { %10 = vsyncpa [#allocation3], 0  ;;  %s1583_s0 = inlined_call_operand.hbm [shape: f32[256,128], index: 0, kind: input, shape index: {}]   ;;  %s1584_s1 = inlined_call_operand.hbm [shape: f32[128,128], index: 1, kind: input, shape index: {}]   ;;  %s1585_s2 = inlined_call_operand.vmem [shape: f32[1,128], index: 2, kind: input, shape index: {}]   ;;  %s1586_s3 = inlined_call_operand.hbm [shape: f32[128,128], index: 3, kind: input, shape index: {}]   ;;  %s1587_s4 = inlined_call_operand.vmem [shape: f32[1,128], index: 4, kind: input, shape index: {}]   ;;  %s1588_s5 = inlined_call_operand.hbm [shape: f32[256,128], index: 5, kind: output, shape index: {}]  }
   0x1   :  { %12 = vsyncpa [#allocation3 + $0x1], 0 }
   0x2   :  { %13 = vsyncpa [#allocation6], 0 }
   0x3   :  { %14 = vsyncpa [#allocation4], 0 }
   0x4   :  { %16 = vsyncpa [#allocation4 + $0x1], 0  ;;  %s1293_s18 = smov 0   ;;  %s1295_s19 = smov 0  }
   0x5   :  { %s1297_s20 = smov 0   ;;  %s1299_s21 = smov 0  }
   0x6 LB: > { %s1314_s22 = sadd.s32 4294967295, %s1253_s21   ;;  %s764_s23 = sadd.s32 4294967294, %s1253_s21   ;;  %s1253_s21 = sphi %s1299_s21, %s1608_s21   ;;  %s1249_s20 = sphi %s1297_s20, %s1607_s20   ;;  %s1245_s19 = sphi %s1295_s19, %s1606_s19   ;;  %s1241_s18 = sphi %s1293_s18, %s1605_s18  }
   0x7   : > { %p42_p0 = scmp.ne.s32.totalorder %s1245_s19, %s1241_s18  ;;  %p1589_p1 = scmp.eq.s32.totalorder %s1314_s22, 0 }
   0x8   : > { %p156_p3 = scmp.eq.s32.totalorder %s764_s23, 1  ;;  %p765_p5 = scmp.ge.s32.totalorder %s1253_s21, 1 }
   0x9   : > { %p1323_p4 = por %p1589_p1, %p42_p0  ;;  %p163_p7 = scmp.lt.s32.totalorder %s1253_s21, 3 }
   0xa   : > { %p1328_p6 = por %p156_p3, %p42_p0  ;;  %s1255_s27 = smov [#allocation5]  }
   0xb   : > { %s1592_s24 = scalar_select %p1323_p4, 1, 0 }
   0xc   : > { %s1593_s25 = scalar_select %p1328_p6, 1, 0 }
   0xd   : > { %p1333_p8 = pnand %p765_p5, %p163_p7  ;;  %s175_s28 = sshll.u32 %s1255_s27, 4  ;;  %s1337_s28 = int_to_ptr.vmem [resolvable:$true] %s175_s28 }
   0xe   : > { %s1256_s30 = smov [#allocation7]   ;;  %s1097_s9 = scalar_lea.hbm %s1584_s1, 2048 }
   0xf   : > { %p1038_p9 = pneg %p1333_p8  ;;  %s191_s6 = sshll.u32 %s1256_s30, 4  ;;  %s1348_s6 = int_to_ptr.vmem [resolvable:$true] %s191_s6 }
  0x10   : > { %p1098_p12 = scmp.ne.s32.totalorder %s1584_s1, %s1097_s9  ;;  %p1104_p5 = scmp.lt.u32.totalorder %s1097_s9, %s1584_s1 }
  0x11   : > { %p1344_p11 = pnand %p1038_p9, %p1589_p1 }
  0x13   : > { %p1099_p13 = pneg %p1344_p11 }
  0x15   : > { %p1100_p0 = pnand %p1099_p13, %p1098_p12 }
  0x17   : > { %p1101_p3 = pneg %p1100_p0 }
  0x19   : > { %p1106_p7 = pnand %p1104_p5, %p1101_p3 }
  0x1b   : > { %1109 = shalt.err (!%p1106_p7)
}
  0x1c   : > { %s1110_s14 = scalar_lea.vmem %s1337_s28, 2048  ;;  %p1118_p2 = scmp.lt.s32.totalorder %s1337_s28, %s1337_s28 }
  0x1d   : > { %p1111_p9 = scmp.ne.s32.totalorder %s1337_s28, %s1110_s14  ;;  %p1119_p12 = scmp.lt.s32.totalorder %s1110_s14, %s1110_s14 }
  0x1f   : > { %p1113_p10 = pnand %p1111_p9, %p1099_p13  ;;  %p1120_p0 = por %p1119_p12, %p1118_p2 }
  0x21   : > { %p1114_p1 = pneg %p1113_p10 }
  0x23   : > { %p1121_p6 = pnand %p1120_p0, %p1114_p1 }
  0x25   : > { %1124 = shalt.err (!%p1121_p6)
}
  0x26   : > { %s1257_s15 = smov 128   ;;  %s1258_s16 = smov 8  }
  0x27   : > { %1041 = dma.hbm_to_vmem [thread:$0]  (!%p1344_p11), %s1584_s1, 2048, %s1337_s28, [#allocation6], %s1257_s15, %s1257_s15, %s1258_s16  }
  0x28   : > { %s1125_s7 = scalar_lea.hbm %s1586_s3, 2048 }
  0x29   : > { %p1126_p1 = scmp.ne.s32.totalorder %s1586_s3, %s1125_s7  ;;  %p1132_p10 = scmp.lt.u32.totalorder %s1125_s7, %s1586_s3 }
  0x2b   : > { %p1128_p2 = pnand %p1126_p1, %p1099_p13 }
  0x2d   : > { %p1129_p6 = pneg %p1128_p2 }
  0x2f   : > { %p1134_p3 = pnand %p1132_p10, %p1129_p6 }
  0x31   : > { %1137 = shalt.err (!%p1134_p3)
}
  0x32   : > { %s1138_s28 = scalar_lea.vmem %s1348_s6, 2048  ;;  %p1146_p12 = scmp.lt.s32.totalorder %s1348_s6, %s1348_s6 }
  0x33   : > { %p1139_p5 = scmp.ne.s32.totalorder %s1348_s6, %s1138_s28  ;;  %p1147_p0 = scmp.lt.s32.totalorder %s1138_s28, %s1138_s28 }
  0x35   : > { %p1141_p7 = pnand %p1139_p5, %p1099_p13  ;;  %p1148_p1 = por %p1147_p0, %p1146_p12 }
  0x37   : > { %p1142_p9 = pneg %p1141_p7 }
  0x39   : > { %p1149_p2 = pnand %p1148_p1, %p1142_p9 }
  0x3b   : > { %1152 = shalt.err (!%p1149_p2)
}
  0x3c   : > { %1044 = dma.hbm_to_vmem [thread:$0]  (!%p1344_p11), %s1586_s3, 2048, %s1348_s6, [#allocation6], %s1257_s15, %s1257_s15, %s1258_s16  }
  0x3d   : > { %s1409_s29 = sadd.s32 1, %s1253_s21   ;;  %s29_s14 = sadd.s32 1, %s1249_s20 }
  0x3e   : > { %s26_s17 = ssub.s32 %s1253_s21, %s1409_s29  ;;  %p36_p13 = scmp.ne.s32.totalorder %s1249_s20, %s1245_s19 }
  0x3f   : > { %p27_p6 = scmp.eq.s32.totalorder %s26_s17, 0  ;;  %p37_p10 = scmp.eq.s32.totalorder %s1253_s21, 0 }
  0x40   : > { %p1596_p3 = scmp.eq.s32.totalorder %s1314_s22, 1  ;;  %p1055_p7 = scmp.lt.s32.totalorder %s1253_s21, 2 }
  0x41   : > { %s1425_s27 = scalar_select %p27_p6, %s1249_s20, %s29_s14  }
  0x42   : > { %p1419_p5 = por %p1596_p3, %p36_p13  ;;  %p38_p9 = por %p37_p10, %p36_p13 }
  0x43   : > { %s208_s30 = sand.u32 1, %s1249_s20   ;;  %s784_s6 = sshll.u32 %s1253_s21, 11 }
  0x44   : > { %s1597_s23 = scalar_select %p1419_p5, 1, 0 }
  0x45   : > { %s769_s7 = sshll.u32 %s208_s30, 7  ;;  %s1432_s10 = scalar_lea.hbm %s1583_s0, %s784_s6 }
  0x46   : > { %s212_s11 = scalar_lea.vmem [#allocation2], %s769_s7  ;;  %p1436_p11 = pnand %p1055_p7, %p38_p9 }
  0x47   : > { %s219_s28 = sshll.u32 %s212_s11, 4  ;;  %s1440_s13 = scalar_lea.sflag [#allocation3], %s208_s30  ;;  %s1434_s28 = int_to_ptr.vmem [resolvable:$true] %s219_s28 }
  0x48   : > { %s1153_s14 = scalar_lea.hbm %s1432_s10, 2048  ;;  %p1155_p0 = pneg %p1436_p11 }
  0x49   : > { %p1154_p12 = scmp.ne.s32.totalorder %s1432_s10, %s1153_s14  ;;  %s1158_s6 = scalar_lea.hbm %s1583_s0, 4096 }
  0x4a   : > { %p1159_p13 = scmp.lt.u32.totalorder %s1432_s10, %s1583_s0  ;;  %p1160_p6 = scmp.lt.u32.totalorder %s1158_s6, %s1153_s14 }
  0x4b   : > { %p1156_p1 = pnand %p1155_p0, %p1154_p12  ;;  %p1162_p3 = scmp.lt.u32.totalorder %s1153_s14, %s1432_s10 }
  0x4c   : > { %p1161_p10 = por %p1160_p6, %p1159_p13 }
  0x4d   : > { %p1157_p2 = pneg %p1156_p1 }
  0x4e   : > { %p1163_p7 = por %p1162_p3, %p1161_p10 }
  0x50   : > { %p1164_p9 = pnand %p1163_p7, %p1157_p2 }
  0x52   : > { %1167 = shalt.err (!%p1164_p9)
}
  0x53   : > { %s1168_s30 = scalar_lea.vmem %s1434_s28, 2048  ;;  %s1259_s11 = smov [#allocation2]  }
  0x54   : > { %p1169_p12 = scmp.ne.s32.totalorder %s1434_s28, %s1168_s30  ;;  %s1173_s17 = sshll.u32 %s1259_s11, 4  ;;  %s1174_s17 = int_to_ptr.vmem [resolvable:$false] %s1173_s17 }
  0x55   : > { %s1175_s7 = scalar_lea.vmem %s1174_s17, 4096  ;;  %p1176_p4 = scmp.lt.s32.totalorder %s1434_s28, %s1174_s17 }
  0x56   : > { %p1171_p1 = pnand %p1169_p12, %p1155_p0  ;;  %p1177_p13 = scmp.lt.s32.totalorder %s1175_s7, %s1168_s30 }
  0x58   : > { %p1172_p5 = pneg %p1171_p1  ;;  %p1178_p6 = por %p1177_p13, %p1176_p4 }
  0x5a   : > { %p1179_p10 = pnand %p1178_p6, %p1172_p5 }
  0x5c   : > { %1182 = shalt.err (!%p1179_p10)
}
  0x5d   : > { %1048 = dma.hbm_to_vmem [thread:$0]  (!%p1436_p11), %s1432_s10, 2048, %s1434_s28, %s1440_s13, %s1257_s15, %s1257_s15, %s1258_s16  }
  0x5e   : > { %231 = sbr.rel (%p1333_p8) target bundleno = 616 (0x268), region = 40  ;;  %s1474_s14 = sand.u32 (!%p1333_p8), 1, %s1245_s19  }
  0x5f   : > { %s773_s6 = sshll.u32 (!%p1333_p8), %s1474_s14, 7  ;;  %s234_s8 = scalar_lea.sflag (!%p1333_p8), [#allocation3], %s1474_s14 }
  0x60   : > { %s1480_s12 = scalar_lea.vmem (!%p1333_p8), [#allocation2], %s773_s6  ;;  %p1599_p4 = scmp.ne.s32.totalorder (!%p1333_p8), %s1592_s24, 0 }
  0x65   : > { %1228 = dma.done.wait (%p1599_p4), %s234_s8, 2048  }
  0x66   : > { %1230 = vsyncadd (%p1599_p4), %s234_s8, 4294965248  ;;  %p1600_p5 = scmp.eq.s32.totalorder %s1314_s22, 0 }
  0x68   : > { %1232 = dma.done.wait (%p1600_p5), [#allocation6], 4096   ;;  %p1601_p8 = pmov %p1600_p5 }
  0x69   : > { %v290_v0 = vld [vmem:[#allocation5] sm:$0xff]  ;;  %v291_v1 = vld [vmem:[#allocation5 + $0x8] sm:$0xff]  ;;  %v292_v2 = vld [vmem:[#allocation5 + $0x10] sm:$0xff]  ;;  %s1514_s10 = scalar_lea.vmem [#allocation8], %s773_s6  ;;  %s785_s28 = sshll.u32 %s1314_s22, 11 }
  0x6a   : > { %1234 = vsyncadd (%p1601_p8), [#allocation6], 4294963200  ;;  %v962_v3 = vpack.c.bf16 %v291_v1, %v290_v0  ;;  %v293_v4 = vld [vmem:[#allocation5 + $0x18] sm:$0xff]  ;;  %v294_v6 = vld [vmem:[#allocation5 + $0x20] sm:$0xff]  ;;  %s672_s13 = sshll.u32 %s1514_s10, 4  ;;  %s1535_s11 = scalar_lea.hbm %s1588_s5, %s785_s28  ;;  %s1537_s13 = int_to_ptr.vmem [resolvable:$true] %s672_s13 }
  0x6b   : > { %v966_v5 = vpack.c.bf16 %v293_v4, %v292_v2  ;;  %v295_v7 = vld [vmem:[#allocation5 + $0x28] sm:$0xff]  ;;  %v274_v9 = vld [vmem:[%s1480_s12] sm:$0xff]  ;;  %v296_v10 = vld [vmem:[#allocation5 + $0x30] sm:$0xff]  ;;  %s659_s22 = scalar_lea.sflag [#allocation4], %s1474_s14  ;;  %s1183_s17 = scalar_lea.vmem %s1537_s13, 2048 }
  0x6c   : > { %963 = vmatprep.subr.bf16.mxu0 %v962_v3  ;;  %v970_v8 = vpack.c.bf16 %v295_v7, %v294_v6  ;;  %v297_v11 = vld [vmem:[#allocation5 + $0x38] sm:$0xff]  ;;  %882 = vmatprep.mubr.f32.mxu0 %v274_v9  ;;  %v298_v13 = vld [vmem:[#allocation5 + $0x40] sm:$0xff]  ;;  %v299_v14 = vld [vmem:[#allocation5 + $0x48] sm:$0xff]  ;;  %p1184_p11 = scmp.ne.s32.totalorder %s1537_s13, %s1183_s17  ;;  %p1602_p0 = scmp.ne.s32.totalorder %s1597_s23, 0 }
  0x6d   : > { %965 = vmatpush3.bf16.msra.mxu0 %v962_v3  ;;  %v974_v12 = vpack.c.bf16 %v297_v11, %v296_v10  ;;  %v474_v15 = vld [vmem:[#allocation7] sm:$0xff]  ;;  %v475_v16 = vld [vmem:[#allocation7 + $0x8] sm:$0xff]  ;;  %v476_v17 = vld [vmem:[#allocation7 + $0x10] sm:$0xff]  ;;  %v978_v21 = vpack.c.bf16 %v299_v14, %v298_v13  ;;  %s1260_s7 = smov [#allocation8]  }
  0x6e   : > { %967 = vmatprep.subr.bf16.mxu0 %v966_v5  ;;  %v477_v18 = vld [vmem:[#allocation7 + $0x18] sm:$0xff]  ;;  %v994_v19 = vpack.c.bf16 %v475_v16, %v474_v15  ;;  %v478_v22 = vld [vmem:[#allocation7 + $0x20] sm:$0xff]  ;;  %v479_v23 = vld [vmem:[#allocation7 + $0x28] sm:$0xff]  ;;  %p1185_p2 = pnand %p1184_p11, %p1602_p0  ;;  %s1187_s6 = sshll.u32 %s1260_s7, 4  ;;  %s1188_s6 = int_to_ptr.vmem [resolvable:$false] %s1187_s6 }
  0x6f   : > { %v998_v20 = vpack.c.bf16 %v477_v18, %v476_v17  ;;  %v300_v24 = vld [vmem:[#allocation5 + $0x50] sm:$0xff]  ;;  %v301_v25 = vld [vmem:[#allocation5 + $0x58] sm:$0xff]  ;;  %v1002_v26 = vpack.c.bf16 %v479_v23, %v478_v22  ;;  %v302_v30 = vld [vmem:[#allocation5 + $0x60] sm:$0xff]  ;;  %s1189_s8 = scalar_lea.vmem %s1188_s6, 4096  ;;  %p1190_p7 = scmp.lt.s32.totalorder %s1537_s13, %s1188_s6 }
  0x70   : > { %995 = vmatprep.subr.bf16.mxu1 %v994_v19  ;;  %v982_v27 = vpack.c.bf16 %v301_v25, %v300_v24  ;;  %v480_v28 = vld [vmem:[#allocation7 + $0x30] sm:$0xff]  ;;  %v481_v29 = vld [vmem:[#allocation7 + $0x38] sm:$0xff]  ;;  %v303_v31 = vld [vmem:[#allocation5 + $0x68] sm:$0xff]  ;;  %p1186_p3 = pneg %p1185_p2  ;;  %p1191_p9 = scmp.lt.s32.totalorder %s1189_s8, %s1183_s17 }
  0x71   : > { %969 = vmatpush3.bf16.msra.mxu0 %v966_v5  ;;  %997 = vmatpush3.bf16.msra.mxu1 %v994_v19  ;;  %v1006_v32 = vpack.c.bf16 %v481_v29, %v480_v28  ;;  %v986_v33 = vpack.c.bf16 %v303_v31, %v302_v30  ;;  %v482_v34 = vld [vmem:[#allocation7 + $0x40] sm:$0xff]  ;;  %v483_v35 = vld [vmem:[#allocation7 + $0x48] sm:$0xff]  ;;  %v304_v36 = vld [vmem:[#allocation5 + $0x70] sm:$0xff] }
  0x72   : > { %971 = vmatprep.subr.bf16.mxu0 %v970_v8  ;;  %999 = vmatprep.subr.bf16.mxu1 %v998_v20  ;;  %v305_v37 = vld [vmem:[#allocation5 + $0x78] sm:$0xff]  ;;  %v1010_v38 = vpack.c.bf16 %v483_v35, %v482_v34  ;;  %v484_v40 = vld [vmem:[#allocation7 + $0x50] sm:$0xff]  ;;  %v486_v43 = vld [vmem:[#allocation7 + $0x60] sm:$0xff]  ;;  %p1192_p12 = por %p1191_p9, %p1190_p7 }
  0x73   : > { %v990_v39 = vpack.c.bf16 %v305_v37, %v304_v36  ;;  %v485_v41 = vld [vmem:[#allocation7 + $0x58] sm:$0xff]  ;;  %v487_v44 = vld [vmem:[#allocation7 + $0x68] sm:$0xff]  ;;  %v276_v47 = vld [vmem:[%s1480_s12 + $0x10] sm:$0xff] }
  0x74   : > { %v1014_v42 = vpack.c.bf16 %v485_v41, %v484_v40  ;;  %v275_v45 = vld [vmem:[%s1480_s12 + $0x8] sm:$0xff]  ;;  %v1018_v46 = vpack.c.bf16 %v487_v44, %v486_v43  ;;  %v277_v48 = vld [vmem:[%s1480_s12 + $0x18] sm:$0xff]  ;;  %v278_v49 = vld [vmem:[%s1480_s12 + $0x20] sm:$0xff]  ;;  %p1193_p1 = pnand %p1192_p12, %p1186_p3 }
  0x75   : > { %973 = vmatpush3.bf16.msra.mxu0 %v970_v8  ;;  %1001 = vmatpush3.bf16.msra.mxu1 %v998_v20  ;;  %v279_v50 = vld [vmem:[%s1480_s12 + $0x28] sm:$0xff]  ;;  %v280_v51 = vld [vmem:[%s1480_s12 + $0x30] sm:$0xff]  ;;  %v281_v52 = vld [vmem:[%s1480_s12 + $0x38] sm:$0xff] }
  0x76   : > { %975 = vmatprep.subr.bf16.mxu0 %v974_v12  ;;  %1003 = vmatprep.subr.bf16.mxu1 %v1002_v26  ;;  %v282_v53 = vld [vmem:[%s1480_s12 + $0x40] sm:$0xff]  ;;  %v283_v54 = vld [vmem:[%s1480_s12 + $0x48] sm:$0xff]  ;;  %v284_v55 = vld [vmem:[%s1480_s12 + $0x50] sm:$0xff] }
  0x77   : > { %v285_v56 = vld [vmem:[%s1480_s12 + $0x58] sm:$0xff]  ;;  %v286_v57 = vld [vmem:[%s1480_s12 + $0x60] sm:$0xff]  ;;  %v287_v58 = vld [vmem:[%s1480_s12 + $0x68] sm:$0xff] }
  0x78   : > { %v288_v59 = vld [vmem:[%s1480_s12 + $0x70] sm:$0xff]  ;;  %v289_v60 = vld [vmem:[%s1480_s12 + $0x78] sm:$0xff]  ;;  %v777_v0 = vld [vmem:[%s1585_s2] ss:$0 sm:$0xff] }
  0x79   : > { %977 = vmatpush3.bf16.msra.mxu0 %v974_v12  ;;  %1005 = vmatpush3.bf16.msra.mxu1 %v1002_v26  ;;  %v488_v61 = vld [vmem:[#allocation7 + $0x70] sm:$0xff]  ;;  %v489_v62 = vld [vmem:[#allocation7 + $0x78] sm:$0xff] }
  0x7a   : > { %979 = vmatprep.subr.bf16.mxu0 %v978_v21  ;;  %1007 = vmatprep.subr.bf16.mxu1 %v1006_v32  ;;  %v1022_v63 = vpack.c.bf16 %v489_v62, %v488_v61 }
  0x7d   : > { %981 = vmatpush3.bf16.msra.mxu0 %v978_v21  ;;  %1009 = vmatpush3.bf16.msra.mxu1 %v1006_v32 }
  0x7e   : > { %983 = vmatprep.subr.bf16.mxu0 %v982_v27  ;;  %1011 = vmatprep.subr.bf16.mxu1 %v1010_v38 }
  0x81   : > { %985 = vmatpush3.bf16.msra.mxu0 %v982_v27  ;;  %1013 = vmatpush3.bf16.msra.mxu1 %v1010_v38 }
  0x82   : > { %987 = vmatprep.subr.bf16.mxu0 %v986_v33  ;;  %1015 = vmatprep.subr.bf16.mxu1 %v1014_v42 }
  0x85   : > { %989 = vmatpush3.bf16.msra.mxu0 %v986_v33  ;;  %1017 = vmatpush3.bf16.msra.mxu1 %v1014_v42 }
  0x86   : > { %991 = vmatprep.subr.bf16.mxu0 %v990_v39  ;;  %1019 = vmatprep.subr.bf16.mxu1 %v1018_v46 }
  0x89   : > { %993 = vmatpush3.bf16.msra.mxu0 %v990_v39  ;;  %1021 = vmatpush3.bf16.msra.mxu1 %v1018_v46 }
  0x8a   : > { %1023 = vmatprep.subr.bf16.mxu1 %v1022_v63 }
  0x8c   : > { %883 = vmatmul.mubr.f32.vlgmr.msra.gmra.mrb[0].mxu0 %v275_v45 }
  0x8d   : > { %885 = vmatprep.mubr.f32.mxu0 %v276_v47  ;;  %1025 = vmatpush3.bf16.msra.mxu1 %v1022_v63 }
  0x90   : > { %886 = vmatmul.mubr.f32.gmra.mrb[2].mxu0 %v277_v48 }
  0x91   : > { %888 = vmatprep.mubr.f32.mxu0 %v278_v49  ;;  %v778_v49 = vld [vmem:[%s1587_s4] ss:$0 sm:$0xff] }
  0x94   : > { %889 = vmatmul.mubr.f32.gmra.mrb[4].mxu0 %v279_v50 }
  0x95   : > { %891 = vmatprep.mubr.f32.mxu0 %v280_v51 }
  0x98   : > { %892 = vmatmul.mubr.f32.gmra.mrb[6].mxu0 %v281_v52 }
  0x99   : > { %894 = vmatprep.mubr.f32.mxu0 %v282_v53 }
  0x9c   : > { %895 = vmatmul.mubr.f32.gmra.mrb[8].mxu0 %v283_v54 }
  0x9d   : > { %897 = vmatprep.mubr.f32.mxu0 %v284_v55 }
  0xa0   : > { %898 = vmatmul.mubr.f32.gmra.mrb[10].mxu0 %v285_v56 }
  0xa1   : > { %900 = vmatprep.mubr.f32.mxu0 %v286_v57 }
  0xa4   : > { %901 = vmatmul.mubr.f32.gmra.mrb[12].mxu0 %v287_v58 }
  0xa5   : > { %903 = vmatprep.mubr.f32.mxu0 %v288_v59 }
  0xa8   : > { %904 = vmatmul.mubr.f32.gmra.mrb[14].mxu0 %v289_v60 }
 0x15f   : > { %v884_v1 = vpop.f32.mrb[0].mxu0 }
 0x160   : > { %v385_v2 = vadd.f32 %v884_v1, %v777_v0  ;;  %v379_v3 = vpop.f32.mrb[1].mxu0 }
 0x161   : > { %v380_v4 = vadd.f32 %v777_v0, %v379_v3 }
 0x162   : > { %v459_v7 = vmax.f32 %v385_v2, 0.0 }
 0x163   : > { %v887_v5 = vpop.f32.mrb[2].mxu0  ;;  %v458_v6 = vmax.f32 %v380_v4, 0.0 }
 0x164   : > { %v395_v8 = vadd.f32 %v887_v5, %v777_v0  ;;  %v389_v9 = vpop.f32.mrb[3].mxu0 }
 0x165   : > { %v390_v10 = vadd.f32 %v777_v0, %v389_v9  ;;  %938 = vmatprep.mubr.f32.mxu1 %v458_v6 }
 0x166   : > { %939 = vmatmul.mubr.f32.vlgmr.msra.gmra.mrb[0].mxu1 %v459_v7  ;;  %v461_v13 = vmax.f32 %v395_v8, 0.0 }
 0x167   : > { %v460_v11 = vmax.f32 %v390_v10, 0.0  ;;  %v890_v12 = vpop.f32.mrb[4].mxu0 }
 0x168   : > { %v405_v14 = vadd.f32 %v890_v12, %v777_v0  ;;  %v399_v15 = vpop.f32.mrb[5].mxu0 }
 0x169   : > { %v400_v16 = vadd.f32 %v777_v0, %v399_v15  ;;  %941 = vmatprep.mubr.f32.mxu1 %v460_v11 }
 0x16a   : > { %942 = vmatmul.mubr.f32.gmra.mrb[2].mxu1 %v461_v13  ;;  %v463_v19 = vmax.f32 %v405_v14, 0.0 }
 0x16b   : > { %v462_v17 = vmax.f32 %v400_v16, 0.0  ;;  %v893_v18 = vpop.f32.mrb[6].mxu0 }
 0x16c   : > { %v415_v20 = vadd.f32 %v893_v18, %v777_v0  ;;  %v409_v21 = vpop.f32.mrb[7].mxu0 }
 0x16d   : > { %v410_v22 = vadd.f32 %v777_v0, %v409_v21  ;;  %944 = vmatprep.mubr.f32.mxu1 %v462_v17 }
 0x16e   : > { %945 = vmatmul.mubr.f32.gmra.mrb[4].mxu1 %v463_v19  ;;  %v465_v25 = vmax.f32 %v415_v20, 0.0 }
 0x16f   : > { %v464_v23 = vmax.f32 %v410_v22, 0.0  ;;  %v896_v24 = vpop.f32.mrb[8].mxu0 }
 0x170   : > { %v425_v26 = vadd.f32 %v896_v24, %v777_v0  ;;  %v419_v27 = vpop.f32.mrb[9].mxu0 }
 0x171   : > { %v420_v28 = vadd.f32 %v777_v0, %v419_v27  ;;  %947 = vmatprep.mubr.f32.mxu1 %v464_v23 }
 0x172   : > { %948 = vmatmul.mubr.f32.gmra.mrb[6].mxu1 %v465_v25  ;;  %v467_v31 = vmax.f32 %v425_v26, 0.0 }
 0x173   : > { %v466_v29 = vmax.f32 %v420_v28, 0.0  ;;  %v899_v30 = vpop.f32.mrb[10].mxu0 }
 0x174   : > { %v435_v32 = vadd.f32 %v899_v30, %v777_v0  ;;  %v429_v33 = vpop.f32.mrb[11].mxu0 }
 0x175   : > { %v430_v34 = vadd.f32 %v777_v0, %v429_v33  ;;  %950 = vmatprep.mubr.f32.mxu1 %v466_v29 }
 0x176   : > { %951 = vmatmul.mubr.f32.gmra.mrb[8].mxu1 %v467_v31  ;;  %v469_v37 = vmax.f32 %v435_v32, 0.0 }
 0x177   : > { %v468_v35 = vmax.f32 %v430_v34, 0.0  ;;  %v902_v36 = vpop.f32.mrb[12].mxu0 }
 0x178   : > { %v445_v38 = vadd.f32 %v902_v36, %v777_v0  ;;  %v439_v39 = vpop.f32.mrb[13].mxu0 }
 0x179   : > { %v440_v40 = vadd.f32 %v777_v0, %v439_v39  ;;  %953 = vmatprep.mubr.f32.mxu1 %v468_v35 }
 0x17a   : > { %954 = vmatmul.mubr.f32.gmra.mrb[10].mxu1 %v469_v37  ;;  %v471_v43 = vmax.f32 %v445_v38, 0.0 }
 0x17b   : > { %v470_v41 = vmax.f32 %v440_v40, 0.0  ;;  %v905_v42 = vpop.f32.mrb[14].mxu0 }
 0x17c   : > { %v455_v44 = vadd.f32 %v905_v42, %v777_v0  ;;  %v449_v45 = vpop.f32.mrb[15].mxu0 }
 0x17d   : > { %v450_v46 = vadd.f32 %v777_v0, %v449_v45  ;;  %956 = vmatprep.mubr.f32.mxu1 %v470_v41 }
 0x17e   : > { %957 = vmatmul.mubr.f32.gmra.mrb[12].mxu1 %v471_v43  ;;  %v473_v48 = vmax.f32 %v455_v44, 0.0 }
 0x17f   : > { %v472_v47 = vmax.f32 %v450_v46, 0.0 }
 0x181   : > { %959 = vmatprep.mubr.f32.mxu1 %v472_v47 }
 0x182   : > { %960 = vmatmul.mubr.f32.gmra.mrb[14].mxu1 %v473_v48 }
 0x239   : > { %v940_v50 = vpop.f32.mrb[0].mxu1 }
 0x23a   : > { %v569_v51 = vadd.f32 %v940_v50, %v778_v49  ;;  %v563_v52 = vpop.f32.mrb[1].mxu1 }
 0x23b   : > { %v564_v53 = vadd.f32 %v778_v49, %v563_v52 }
 0x23c   : > { %643 = vst [vmem:[%s1514_s10 + $0x8] sm:$0xff] %v569_v51 }
 0x23d   : > { %642 = vst [vmem:[%s1514_s10] sm:$0xff] %v564_v53  ;;  %v943_v54 = vpop.f32.mrb[2].mxu1 }
 0x23e   : > { %v579_v55 = vadd.f32 %v943_v54, %v778_v49  ;;  %v573_v56 = vpop.f32.mrb[3].mxu1 }
 0x23f   : > { %v574_v57 = vadd.f32 %v778_v49, %v573_v56 }
 0x240   : > { %645 = vst [vmem:[%s1514_s10 + $0x18] sm:$0xff] %v579_v55 }
 0x241   : > { %644 = vst [vmem:[%s1514_s10 + $0x10] sm:$0xff] %v574_v57  ;;  %v946_v58 = vpop.f32.mrb[4].mxu1 }
 0x242   : > { %v589_v59 = vadd.f32 %v946_v58, %v778_v49  ;;  %v583_v60 = vpop.f32.mrb[5].mxu1 }
 0x243   : > { %v584_v61 = vadd.f32 %v778_v49, %v583_v60 }
 0x244   : > { %647 = vst [vmem:[%s1514_s10 + $0x28] sm:$0xff] %v589_v59 }
 0x245   : > { %646 = vst [vmem:[%s1514_s10 + $0x20] sm:$0xff] %v584_v61  ;;  %v949_v62 = vpop.f32.mrb[6].mxu1 }
 0x246   : > { %v599_v63 = vadd.f32 %v949_v62, %v778_v49  ;;  %v593_v0 = vpop.f32.mrb[7].mxu1 }
 0x247   : > { %v594_v1 = vadd.f32 %v778_v49, %v593_v0 }
 0x248   : > { %649 = vst [vmem:[%s1514_s10 + $0x38] sm:$0xff] %v599_v63 }
 0x249   : > { %648 = vst [vmem:[%s1514_s10 + $0x30] sm:$0xff] %v594_v1  ;;  %v952_v2 = vpop.f32.mrb[8].mxu1 }
 0x24a   : > { %v609_v3 = vadd.f32 %v952_v2, %v778_v49  ;;  %v603_v4 = vpop.f32.mrb[9].mxu1 }
 0x24b   : > { %v604_v5 = vadd.f32 %v778_v49, %v603_v4 }
 0x24c   : > { %651 = vst [vmem:[%s1514_s10 + $0x48] sm:$0xff] %v609_v3 }
 0x24d   : > { %650 = vst [vmem:[%s1514_s10 + $0x40] sm:$0xff] %v604_v5  ;;  %v955_v6 = vpop.f32.mrb[10].mxu1 }
 0x24e   : > { %v619_v7 = vadd.f32 %v955_v6, %v778_v49  ;;  %v613_v8 = vpop.f32.mrb[11].mxu1 }
 0x24f   : > { %v614_v9 = vadd.f32 %v778_v49, %v613_v8 }
 0x250   : > { %653 = vst [vmem:[%s1514_s10 + $0x58] sm:$0xff] %v619_v7 }
 0x251   : > { %652 = vst [vmem:[%s1514_s10 + $0x50] sm:$0xff] %v614_v9  ;;  %v958_v10 = vpop.f32.mrb[12].mxu1 }
 0x252   : > { %v629_v11 = vadd.f32 %v958_v10, %v778_v49  ;;  %v623_v12 = vpop.f32.mrb[13].mxu1 }
 0x253   : > { %v624_v13 = vadd.f32 %v778_v49, %v623_v12 }
 0x254   : > { %655 = vst [vmem:[%s1514_s10 + $0x68] sm:$0xff] %v629_v11 }
 0x255   : > { %654 = vst [vmem:[%s1514_s10 + $0x60] sm:$0xff] %v624_v13  ;;  %v961_v14 = vpop.f32.mrb[14].mxu1 }
 0x256   : > { %v639_v15 = vadd.f32 %v961_v14, %v778_v49  ;;  %v633_v16 = vpop.f32.mrb[15].mxu1 }
 0x257   : > { %v634_v17 = vadd.f32 %v778_v49, %v633_v16 }
 0x258   : > { %657 = vst [vmem:[%s1514_s10 + $0x78] sm:$0xff] %v639_v15 }
 0x259   : > { %656 = vst [vmem:[%s1514_s10 + $0x70] sm:$0xff] %v634_v17 }
 0x25a   : > { %1196 = shalt.err (!%p1193_p1)
}
 0x25b   : > { %s1197_s12 = scalar_lea.hbm %s1535_s11, 2048  ;;  %s1201_s15 = scalar_lea.hbm %s1588_s5, 4096 }
 0x25c   : > { %p1198_p13 = scmp.ne.s32.totalorder %s1535_s11, %s1197_s12  ;;  %p1202_p4 = scmp.lt.u32.totalorder %s1535_s11, %s1588_s5 }
 0x25d   : > { %p1203_p5 = scmp.lt.u32.totalorder %s1201_s15, %s1197_s12  ;;  %p1205_p11 = scmp.lt.u32.totalorder %s1197_s12, %s1535_s11 }
 0x25e   : > { %p1199_p6 = pnand %p1198_p13, %p1602_p0 }
 0x25f   : > { %p1204_p8 = por %p1203_p5, %p1202_p4 }
 0x260   : > { %p1200_p10 = pneg %p1199_p6 }
 0x261   : > { %p1206_p2 = por %p1205_p11, %p1204_p8 }
 0x263   : > { %p1207_p3 = pnand %p1206_p2, %p1200_p10 }
 0x265   : > { %1210 = shalt.err (!%p1207_p3)
}
 0x266   : > { %s1261_s28 = smov 128   ;;  %s1262_s9 = smov 8  }
 0x267   : > { %1036 = dma.vmem_to_hbm [thread:$0]  (%p1602_p0), %s1537_s13, 2048, %s1535_s11, %s659_s22, %s1261_s28, %s1261_s28, %s1262_s9  }
 0x268 PF: > { %s687_s30 = sand.u32 1, %s1241_s18   ;;  %p1603_p7 = scmp.ne.s32.totalorder %s1593_s25, 0 }
 0x269   : > { %p1604_p9 = scmp.ge.s32.totalorder %s1253_s21, 2  ;;  %s688_s17 = scalar_lea.sflag [#allocation4], %s687_s30 }
 0x26b   : > { %p1050_p12 = pnand %p1604_p9, %p1603_p7 }
 0x26d   : > { %1236 = dma.done.wait (!%p1050_p12), %s688_s17, 2048  }
 0x26e   : > { %1238 = vsyncadd (!%p1050_p12), %s688_s17, 4294965248  ;;  %p19_p1 = scmp.ge.s32.totalorder %s1409_s29, 4   ;;  %s1605_s18 = smov %s1245_s19 }
 0x26f   : > { %s1606_s19 = smov %s1249_s20  ;;  %s1607_s20 = smov %s1425_s27 }
 0x270   : > { %s1608_s21 = smov %s1409_s29  ;;  %21 = sbr.rel (!%p19_p1) target bundleno = 6 (0x6), region = 93 }
 0x277   :  { %693 = vsyncpa [#allocation3], 1 }
 0x278   :  { %695 = vsyncpa [#allocation3 + $0x1], 1 }
 0x279   :  { %696 = vsyncpa [#allocation6], 1 }
 0x27a   :  { %697 = vsyncpa [#allocation4], 1 }
 0x27b   :  { %699 = vsyncpa [#allocation4 + $0x1], 1 }

</bundles_post_ra>
